<compile_context>
chip_gen: v5e
topology: v5e:2x2
jax: 0.10.0
libtpu: 0.0.40
codegen_flags: <defaults>
</compile_context>

<pallas_src>
import functools

import jax
import jax.numpy as jnp
from jax.experimental import pallas as pl
from jax.experimental.pallas import tpu as pltpu


def _lstm_chunk_kernel(max_len_ref, lens_ref, x_ref, bias_ref, w_ih_hbm, w_hh_hbm,
                       out_ref, w_ih_vmem, w_hh_vmem, xproj_ref, h_ref, c_ref,
                       *, hidden, chunk, unroll):
    """One LSTM time-chunk. Grid = (batch_shards [parallel], n_chunks [serial])."""
    H = hidden
    ci = pl.program_id(1)
    t0 = ci * chunk

    # --- setup at the first chunk of each batch shard -------------------------
    @pl.when(ci == 0)
    def _init():
        # Single-buffer the constant weights: one DMA into persistent VMEM
        # scratch instead of double-buffering them for every chunk.
        pltpu.sync_copy(w_ih_hbm, w_ih_vmem)
        pltpu.sync_copy(w_hh_hbm, w_hh_vmem)
        # nn.LSTM default: h0 = c0 = 0.
        h_ref[...] = jnp.zeros_like(h_ref)
        c_ref[...] = jnp.zeros_like(c_ref)

    max_len = max_len_ref[0]

    # --- live chunk: hoisted x-projection + serial recurrence -----------------
    @pl.when(t0 < max_len)
    def _compute():
        tc, Bs, F = x_ref.shape
        lens = lens_ref[...]                                   # (Bs, 1) int32
        w_hh = w_hh_vmem[...]                                  # (H, 4H)

        # Hoisted input projection: one full-utilization MXU pass per chunk
        # (M = tc*Bs), bias folded in once; off the serial critical path.
        xp = jnp.dot(x_ref[...].reshape(tc * Bs, F), w_ih_vmem[...],
                     preferred_element_type=jnp.float32)
        xproj_ref[...] = (xp + bias_ref[...]).reshape(tc, Bs, 4 * H)

        # TODO(synk): on v5e, drive the recurrent matmul weight-stationary
        # (pltpu.matmul_push_rhs once per chunk) when H*4H fits staging regs.
        def step(t, carry):
            h_prev, c_prev = carry
            # Only the truly serial work: h_prev @ W_hh^T  (K = H).
            rec = jnp.dot(h_prev.astype(w_hh.dtype), w_hh,
                          preferred_element_type=jnp.float32)
            gates = xproj_ref[t] + rec                         # (Bs, 4H), f32
            # Single full-width EUP pass: i/f/o columns pre-scaled by 0.5 in
            # the wrapper so sigmoid(x) == 0.5*tanh(x/2) + 0.5.
            act = jnp.tanh(gates)
            i_g = 0.5 * act[:, 0 * H:1 * H] + 0.5
            f_g = 0.5 * act[:, 1 * H:2 * H] + 0.5
            g_g = act[:, 2 * H:3 * H]
            o_g = 0.5 * act[:, 3 * H:4 * H] + 0.5
            c_new = f_g * c_prev + i_g * g_g
            h_new = o_g * jnp.tanh(c_new)
            out_ref[t] = h_new.astype(out_ref.dtype)           # VMEM-resident
            return h_new, c_new

        # Partial unroll so the scheduler overlaps step t's VPU/store with
        # step t+1's MXU push (only h/c are serially dependent).
        h_fin, c_fin = jax.lax.fori_loop(0, tc, step, (h_ref[...], c_ref[...]),
                                         unroll=unroll)
        h_ref[...] = h_fin
        c_ref[...] = c_fin

        # pad_packed_sequence semantics: zero outputs past each sequence's
        # length. One bulk masked multiply per chunk, off the serial path.
        t_idx = t0 + jax.lax.broadcasted_iota(jnp.int32, (tc, Bs, H), 0)
        mask = (t_idx < lens.reshape(1, Bs, 1)).astype(out_ref.dtype)
        out_ref[...] = out_ref[...] * mask

    # --- dead chunk (entirely past max length): just zero the output ----------
    @pl.when(t0 >= max_len)
    def _dead():
        out_ref[...] = jnp.zeros_like(out_ref)


def _pick_time_chunk(requested, T, Bs, F, H, mm_bytes, out_bytes, budget_bytes):
    """Largest chunk <= requested whose per-core VMEM working set fits budget."""
    fixed = ((F + H) * 4 * H * mm_bytes      # single-buffered fused weights
             + 2 * 4 * H * 4                 # double-buffered bias (f32)
             + 2 * Bs * H * 4)               # h/c carries (f32)

    def need(tc):
        return (fixed
                + 2 * tc * Bs * F * mm_bytes     # double-buffered x chunk
                + 2 * tc * Bs * H * out_bytes    # double-buffered out chunk
                + tc * Bs * 4 * H * 4)           # x-projection scratch (f32)

    tc = max(1, min(int(requested), T))
    while tc > 1 and need(tc) > budget_bytes:
        tc = max(1, tc // 2)
    return tc, need(tc)


def lstm_encoder_forward(cur_inputs, current_frame, params, *,
                         time_chunk=128, matmul_dtype=jnp.bfloat16,
                         batch_shards=1, unroll=8,
                         vmem_budget_bytes=40 * 1024 * 1024):
    """LSTM_Encoder.forward.

    cur_inputs:    (T, B, F) time-major features.
    current_frame: (B,) lengths, sorted descending (pack_padded_sequence).
    params:        (w_ih (4H,F), w_hh (4H,H), b_ih (4H,), b_hh (4H,)),
                   PyTorch gate order [i, f, g, o].
    batch_shards:  set 2 on v7x (2 TensorCores/chip) when B divides evenly;
                   leave 1 on v5e/v6e (single TensorCore).
    Returns (T, B, H); rows with t >= current_frame[b] are zero.
    """
    T, B, F = cur_inputs.shape
    w_ih, w_hh, b_ih, b_hh = params
    H = w_hh.shape[1]
    assert B % batch_shards == 0, "batch must divide evenly across shards"
    Bs = B // batch_shards

    # Pre-scale i/f/o gate columns by 0.5 (exact in fp) so the kernel can use
    # a single full-width tanh per step: sigmoid(x) == 0.5*tanh(x/2) + 0.5.
    col_scale = jnp.concatenate([
        jnp.full((H,), 0.5, jnp.float32), jnp.full((H,), 0.5, jnp.float32),
        jnp.ones((H,), jnp.float32), jnp.full((H,), 0.5, jnp.float32)])
    w_ih_t = (w_ih.T.astype(jnp.float32) * col_scale[None, :]).astype(matmul_dtype)
    w_hh_t = (w_hh.T.astype(jnp.float32) * col_scale[None, :]).astype(matmul_dtype)
    bias = ((b_ih + b_hh).astype(jnp.float32) * col_scale).reshape(1, 4 * H)

    lens = current_frame.astype(jnp.int32).reshape(B, 1)
    max_len = jnp.max(current_frame).astype(jnp.int32).reshape(1)
    x = cur_inputs.astype(matmul_dtype)          # LHS of the hoisted projection

    mm_bytes = jnp.dtype(matmul_dtype).itemsize
    out_dtype = cur_inputs.dtype
    out_bytes = jnp.dtype(out_dtype).itemsize
    tc, vmem_need = _pick_time_chunk(time_chunk, T, Bs, F, H,
                                     mm_bytes, out_bytes, vmem_budget_bytes)

    n_chunks = -(-T // tc)
    Tp = n_chunks * tc
    if Tp != T:
        x = jnp.concatenate([x, jnp.zeros((Tp - T, B, F), x.dtype)], axis=0)

    kernel = functools.partial(_lstm_chunk_kernel, hidden=H, chunk=tc,
                               unroll=min(int(unroll), tc))

    out = pl.pallas_call(
        kernel,
        out_shape=jax.ShapeDtypeStruct((Tp, B, H), out_dtype),
        grid_spec=pltpu.PrefetchScalarGridSpec(
            num_scalar_prefetch=1,                                # max_len -> SMEM
            grid=(batch_shards, n_chunks),
            in_specs=[
                pl.BlockSpec((Bs, 1), lambda s, c, ml: (s, 0)),         # lengths
                pl.BlockSpec((tc, Bs, F), lambda s, c, ml: (c, s, 0)),  # x chunk
                pl.BlockSpec((1, 4 * H), lambda s, c, ml: (0, 0)),      # fused bias
                pl.BlockSpec(memory_space=pl.ANY),      # W_ih^T stays in HBM
                pl.BlockSpec(memory_space=pl.ANY),      # W_hh^T stays in HBM
            ],
            out_specs=pl.BlockSpec((tc, Bs, H), lambda s, c, ml: (c, s, 0)),
            scratch_shapes=[
                pltpu.VMEM((F, 4 * H), matmul_dtype),      # persistent W_ih^T
                pltpu.VMEM((H, 4 * H), matmul_dtype),      # persistent W_hh^T
                pltpu.VMEM((tc, Bs, 4 * H), jnp.float32),  # chunk x-projection
                pltpu.VMEM((Bs, H), jnp.float32),          # h carry
                pltpu.VMEM((Bs, H), jnp.float32),          # c carry
            ],
        ),
        compiler_params=pltpu.CompilerParams(
            dimension_semantics=("parallel", "arbitrary"),
            vmem_limit_bytes=int(min(max(2 * vmem_need, 32 << 20), 128 << 20))),
    )(max_len, lens, x, bias, w_ih_t, w_hh_t)

    return out[:T]


def _reference_lstm(x, lens, w_ih, w_hh, b_ih, b_hh):
    """Pure-JAX reference with identical packed/padded semantics."""
    T, B, F = x.shape
    H = w_hh.shape[1]

    def step(carry, x_t):
        h, c = carry
        gates = x_t @ w_ih.T + b_ih + h @ w_hh.T + b_hh
        i, f, g, o = jnp.split(gates, 4, axis=-1)
        i, f, o = jax.nn.sigmoid(i), jax.nn.sigmoid(f), jax.nn.sigmoid(o)
        g = jnp.tanh(g)
        c = f * c + i * g
        h = o * jnp.tanh(c)
        return (h, c), h

    init = (jnp.zeros((B, H), jnp.float32), jnp.zeros((B, H), jnp.float32))
    _, hs = jax.lax.scan(step, init, x)
    mask = (jnp.arange(T)[:, None, None] < lens[None, :, None]).astype(x.dtype)
    return hs * mask


if __name__ == "__main__":
    # Module hyper-params (small, consistent with the forward pass):
    feature_dim, hidden_size, num_layers = 16, 32, 1
    T, B = 8, 4

    key = jax.random.PRNGKey(0)
    k_x, k_wi, k_wh, k_bi, k_bh = jax.random.split(key, 5)

    # Deterministic parameter init (same shapes as nn.LSTM layer-0 params).
    k = 1.0 / jnp.sqrt(jnp.float32(hidden_size))
    w_ih = jax.random.uniform(k_wi, (4 * hidden_size, feature_dim),
                              jnp.float32, -k, k)
    w_hh = jax.random.uniform(k_wh, (4 * hidden_size, hidden_size),
                              jnp.float32, -k, k)
    b_ih = jax.random.uniform(k_bi, (4 * hidden_size,), jnp.float32, -k, k)
    b_hh = jax.random.uniform(k_bh, (4 * hidden_size,), jnp.float32, -k, k)
    params = (w_ih, w_hh, b_ih, b_hh)

    # Inputs: (T, B, F), lengths sorted descending (enforce_sorted=True).
    cur_inputs = jax.random.normal(k_x, (T, B, feature_dim), jnp.float32)
    current_frame = jnp.array([8, 7, 5, 3], dtype=jnp.int32)

    ref = jax.block_until_ready(
        _reference_lstm(cur_inputs, current_frame, w_ih, w_hh, b_ih, b_hh))

    # Strict correctness check with f32 MXU operands.
    out_f32 = jax.block_until_ready(
        lstm_encoder_forward(cur_inputs, current_frame, params,
                             matmul_dtype=jnp.float32))
    assert out_f32.shape == (T, B, hidden_size)
    assert jnp.allclose(out_f32, ref, atol=1e-4, rtol=1e-4), (
        float(jnp.max(jnp.abs(out_f32 - ref))))

    # Production default: bf16 MXU operands (gate math / state / accum in f32).
    out_bf16 = jax.block_until_ready(
        lstm_encoder_forward(cur_inputs, current_frame, params))
    assert out_bf16.shape == (T, B, hidden_size)
    assert jnp.allclose(out_bf16, ref, atol=1e-1, rtol=1e-1), (
        float(jnp.max(jnp.abs(out_bf16 - ref))))

    print("KERNEL_OK")
</pallas_src>

<mosaic_0001>
module attributes {stable_mosaic.version = 11 : i64} {
  func.func @_lstm_chunk_kernel(%arg0: i32, %arg1: i32, %arg2: memref<1xi32, #tpu.memory_space<smem>>, %arg3: memref<4x1xi32, #tpu.memory_space<vmem>>, %arg4: memref<8x4x16xf32, #tpu.memory_space<vmem>>, %arg5: memref<1x128xf32, #tpu.memory_space<vmem>>, %arg6: memref<16x128xf32, #tpu.memory_space<any>>, %arg7: memref<32x128xf32, #tpu.memory_space<any>>, %arg8: memref<8x4x32xf32, #tpu.memory_space<vmem>>, %arg9: memref<16x128xf32, #tpu.memory_space<vmem>>, %arg10: memref<32x128xf32, #tpu.memory_space<vmem>>, %arg11: memref<8x4x128xf32, #tpu.memory_space<vmem>>, %arg12: memref<4x32xf32, #tpu.memory_space<vmem>>, %arg13: memref<4x32xf32, #tpu.memory_space<vmem>>) attributes {dimension_semantics = [#tpu.dimension_semantics<parallel>, #tpu.dimension_semantics<arbitrary>], iteration_bounds = array<i64: 1, 1>, scalar_prefetch = 1 : i64, scratch_operands = 5 : i64, tpu.core_type = #tpu.core_type<tc>, window_params = [{transform_indices = @transform_0, window_bounds = array<i64: 4, 1>}, {transform_indices = @transform_1, window_bounds = array<i64: 8, 4, 16>}, {pipeline_mode = #tpu.pipeline_mode<synchronous>, transform_indices = @transform_2, window_bounds = array<i64: 1, 128>}, {}, {}, {transform_indices = @transform_5, window_bounds = array<i64: 8, 4, 32>}]} {
    %c8_i32 = arith.constant 8 : i32
    %0 = arith.muli %arg1, %c8_i32 : i32
    %c0_i32 = arith.constant 0 : i32
    %1 = arith.cmpi eq, %arg1, %c0_i32 : i32
    %2 = arith.extui %1 : i1 to i32
    %c0_i32_0 = arith.constant 0 : i32
    %3 = arith.cmpi ne, %2, %c0_i32_0 : i32
    scf.if %3 {
      "tpu.region"() ({
        %15 = tpu.sem_alloc : memref<!tpu.dma_semaphore, #tpu.memory_space<semaphore_mem>>
        tpu.enqueue_dma source(%arg6 : memref<16x128xf32, #tpu.memory_space<any>>) target(%arg9 : memref<16x128xf32, #tpu.memory_space<vmem>>) target_semaphore(%15 : memref<!tpu.dma_semaphore, #tpu.memory_space<semaphore_mem>>)
        tpu.wait_dma2 semaphore(%15 : memref<!tpu.dma_semaphore, #tpu.memory_space<semaphore_mem>>) src(%arg6 : memref<16x128xf32, #tpu.memory_space<any>>) dst(%arg9 : memref<16x128xf32, #tpu.memory_space<vmem>>)
        tpu.yield
      }) : () -> ()
      "tpu.region"() ({
        %15 = tpu.sem_alloc : memref<!tpu.dma_semaphore, #tpu.memory_space<semaphore_mem>>
        tpu.enqueue_dma source(%arg7 : memref<32x128xf32, #tpu.memory_space<any>>) target(%arg10 : memref<32x128xf32, #tpu.memory_space<vmem>>) target_semaphore(%15 : memref<!tpu.dma_semaphore, #tpu.memory_space<semaphore_mem>>)
        tpu.wait_dma2 semaphore(%15 : memref<!tpu.dma_semaphore, #tpu.memory_space<semaphore_mem>>) src(%arg7 : memref<32x128xf32, #tpu.memory_space<any>>) dst(%arg10 : memref<32x128xf32, #tpu.memory_space<vmem>>)
        tpu.yield
      }) : () -> ()
      %cst = arith.constant 0.000000e+00 : f32
      %11 = vector.broadcast %cst : f32 to vector<4x32xf32>
      %c0_3 = arith.constant 0 : index
      %c0_4 = arith.constant 0 : index
      %12 = vector.load %arg12[%c0_3, %c0_4] : memref<4x32xf32, #tpu.memory_space<vmem>>, vector<4x32xf32>
      tpu.vector_store %arg12[%c0_3, %c0_4], %11 {strides = array<i32>} : memref<4x32xf32, #tpu.memory_space<vmem>>, vector<4x32xf32>,
      %cst_5 = arith.constant 0.000000e+00 : f32
      %13 = vector.broadcast %cst_5 : f32 to vector<4x32xf32>
      %c0_6 = arith.constant 0 : index
      %c0_7 = arith.constant 0 : index
      %14 = vector.load %arg13[%c0_6, %c0_7] : memref<4x32xf32, #tpu.memory_space<vmem>>, vector<4x32xf32>
      tpu.vector_store %arg13[%c0_6, %c0_7], %13 {strides = array<i32>} : memref<4x32xf32, #tpu.memory_space<vmem>>, vector<4x32xf32>,
    } else {
    }
    %c0 = arith.constant 0 : index
    %4 = memref.load %arg2[%c0] : memref<1xi32, #tpu.memory_space<smem>>
    %5 = arith.cmpi slt, %0, %4 : i32
    %6 = arith.extui %5 : i1 to i32
    %c0_i32_1 = arith.constant 0 : i32
    %7 = arith.cmpi ne, %6, %c0_i32_1 : i32
    scf.if %7 {
      %c0_3 = arith.constant 0 : index
      %c0_4 = arith.constant 0 : index
      %11 = vector.load %arg3[%c0_3, %c0_4] : memref<4x1xi32, #tpu.memory_space<vmem>>, vector<4x1xi32>
      %c0_5 = arith.constant 0 : index
      %c0_6 = arith.constant 0 : index
      %12 = vector.load %arg10[%c0_5, %c0_6] : memref<32x128xf32, #tpu.memory_space<vmem>>, vector<32x128xf32>
      %c0_7 = arith.constant 0 : index
      %c0_8 = arith.constant 0 : index
      %c0_9 = arith.constant 0 : index
      %13 = vector.load %arg4[%c0_7, %c0_8, %c0_9] : memref<8x4x16xf32, #tpu.memory_space<vmem>>, vector<8x4x16xf32>
      %14 = vector.shape_cast %13 : vector<8x4x16xf32> to vector<32x16xf32>
      %c0_10 = arith.constant 0 : index
      %c0_11 = arith.constant 0 : index
      %15 = vector.load %arg9[%c0_10, %c0_11] : memref<16x128xf32, #tpu.memory_space<vmem>>, vector<16x128xf32>
      %cst = arith.constant dense<0.000000e+00> : vector<32x128xf32>
      %16 = tpu.matmul %14, %15, %cst {dimension_numbers = #tpu.dot_dimension_numbers<[1], [0], [0], [1], [0, 0, 1, 1], [], []>} : vector<32x16xf32>, vector<16x128xf32>, vector<32x128xf32> -> vector<32x128xf32>
      %c0_12 = arith.constant 0 : index
      %c0_13 = arith.constant 0 : index
      %17 = vector.load %arg5[%c0_12, %c0_13] : memref<1x128xf32, #tpu.memory_space<vmem>>, vector<1x128xf32>
      %18 = vector.broadcast %17 : vector<1x128xf32> to vector<32x128xf32>
      %19 = arith.addf %16, %18 : vector<32x128xf32>
      %20 = vector.shape_cast %19 : vector<32x128xf32> to vector<8x4x128xf32>
      %c0_14 = arith.constant 0 : index
      %c0_15 = arith.constant 0 : index
      %c0_16 = arith.constant 0 : index
      %21 = vector.load %arg11[%c0_14, %c0_15, %c0_16] : memref<8x4x128xf32, #tpu.memory_space<vmem>>, vector<8x4x128xf32>
      tpu.vector_store %arg11[%c0_14, %c0_15, %c0_16], %20 {strides = array<i32>} : memref<8x4x128xf32, #tpu.memory_space<vmem>>, vector<8x4x128xf32>,
      %c0_17 = arith.constant 0 : index
      %c0_18 = arith.constant 0 : index
      %22 = vector.load %arg12[%c0_17, %c0_18] : memref<4x32xf32, #tpu.memory_space<vmem>>, vector<4x32xf32>
      %c0_19 = arith.constant 0 : index
      %c0_20 = arith.constant 0 : index
      %23 = vector.load %arg13[%c0_19, %c0_20] : memref<4x32xf32, #tpu.memory_space<vmem>>, vector<4x32xf32>
      %c0_i32_21 = arith.constant 0 : i32
      %cst_22 = arith.constant dense<0.000000e+00> : vector<4x128xf32>
      %24 = tpu.matmul %22, %12, %cst_22 {dimension_numbers = #tpu.dot_dimension_numbers<[1], [0], [0], [1], [0, 0, 1, 1], [], []>} : vector<4x32xf32>, vector<32x128xf32>, vector<4x128xf32> -> vector<4x128xf32>
      %25 = arith.index_cast %c0_i32_21 : i32 to index
      %c0_23 = arith.constant 0 : index
      %c0_24 = arith.constant 0 : index
      %26 = vector.load %arg11[%25, %c0_23, %c0_24] : memref<8x4x128xf32, #tpu.memory_space<vmem>>, vector<1x4x128xf32>
      %27 = vector.shape_cast %26 : vector<1x4x128xf32> to vector<4x128xf32>
      %28 = arith.addf %27, %24 : vector<4x128xf32>
      %29 = math.tanh %28 : vector<4x128xf32>
      %30 = vector.extract_strided_slice %29 {offsets = [0, 0], sizes = [4, 32], strides = [1, 1]} : vector<4x128xf32> to vector<4x32xf32>
      %cst_25 = arith.constant 5.000000e-01 : f32
      %31 = vector.broadcast %cst_25 : f32 to vector<4x32xf32>
      %32 = arith.mulf %31, %30 : vector<4x32xf32>
      %cst_26 = arith.constant 5.000000e-01 : f32
      %33 = vector.broadcast %cst_26 : f32 to vector<4x32xf32>
      %34 = arith.addf %32, %33 : vector<4x32xf32>
      %35 = vector.extract_strided_slice %29 {offsets = [0, 32], sizes = [4, 32], strides = [1, 1]} : vector<4x128xf32> to vector<4x32xf32>
      %cst_27 = arith.constant 5.000000e-01 : f32
      %36 = vector.broadcast %cst_27 : f32 to vector<4x32xf32>
      %37 = arith.mulf %36, %35 : vector<4x32xf32>
      %cst_28 = arith.constant 5.000000e-01 : f32
      %38 = vector.broadcast %cst_28 : f32 to vector<4x32xf32>
      %39 = arith.addf %37, %38 : vector<4x32xf32>
      %40 = vector.extract_strided_slice %29 {offsets = [0, 64], sizes = [4, 32], strides = [1, 1]} : vector<4x128xf32> to vector<4x32xf32>
      %41 = vector.extract_strided_slice %29 {offsets = [0, 96], sizes = [4, 32], strides = [1, 1]} : vector<4x128xf32> to vector<4x32xf32>
      %cst_29 = arith.constant 5.000000e-01 : f32
      %42 = vector.broadcast %cst_29 : f32 to vector<4x32xf32>
      %43 = arith.mulf %42, %41 : vector<4x32xf32>
      %cst_30 = arith.constant 5.000000e-01 : f32
      %44 = vector.broadcast %cst_30 : f32 to vector<4x32xf32>
      %45 = arith.addf %43, %44 : vector<4x32xf32>
      %46 = arith.mulf %39, %23 : vector<4x32xf32>
      %47 = arith.mulf %34, %40 : vector<4x32xf32>
      %48 = arith.addf %46, %47 : vector<4x32xf32>
      %49 = math.tanh %48 : vector<4x32xf32>
      %50 = arith.mulf %45, %49 : vector<4x32xf32>
      %51 = arith.index_cast %c0_i32_21 : i32 to index
      %c0_31 = arith.constant 0 : index
      %c0_32 = arith.constant 0 : index
      %52 = vector.load %arg8[%51, %c0_31, %c0_32] : memref<8x4x32xf32, #tpu.memory_space<vmem>>, vector<1x4x32xf32>
      %53 = vector.shape_cast %52 : vector<1x4x32xf32> to vector<4x32xf32>
      %54 = vector.shape_cast %50 : vector<4x32xf32> to vector<1x4x32xf32>
      tpu.vector_store %arg8[%51, %c0_31, %c0_32], %54 {strides = array<i32>} : memref<8x4x32xf32, #tpu.memory_space<vmem>>, vector<1x4x32xf32>,
      %c1_i32 = arith.constant 1 : i32
      %cst_33 = arith.constant dense<0.000000e+00> : vector<4x128xf32>
      %55 = tpu.matmul %50, %12, %cst_33 {dimension_numbers = #tpu.dot_dimension_numbers<[1], [0], [0], [1], [0, 0, 1, 1], [], []>} : vector<4x32xf32>, vector<32x128xf32>, vector<4x128xf32> -> vector<4x128xf32>
      %56 = arith.index_cast %c1_i32 : i32 to index
      %c0_34 = arith.constant 0 : index
      %c0_35 = arith.constant 0 : index
      %57 = vector.load %arg11[%56, %c0_34, %c0_35] : memref<8x4x128xf32, #tpu.memory_space<vmem>>, vector<1x4x128xf32>
      %58 = vector.shape_cast %57 : vector<1x4x128xf32> to vector<4x128xf32>
      %59 = arith.addf %58, %55 : vector<4x128xf32>
      %60 = math.tanh %59 : vector<4x128xf32>
      %61 = vector.extract_strided_slice %60 {offsets = [0, 0], sizes = [4, 32], strides = [1, 1]} : vector<4x128xf32> to vector<4x32xf32>
      %cst_36 = arith.constant 5.000000e-01 : f32
      %62 = vector.broadcast %cst_36 : f32 to vector<4x32xf32>
      %63 = arith.mulf %62, %61 : vector<4x32xf32>
      %cst_37 = arith.constant 5.000000e-01 : f32
      %64 = vector.broadcast %cst_37 : f32 to vector<4x32xf32>
      %65 = arith.addf %63, %64 : vector<4x32xf32>
      %66 = vector.extract_strided_slice %60 {offsets = [0, 32], sizes = [4, 32], strides = [1, 1]} : vector<4x128xf32> to vector<4x32xf32>
      %cst_38 = arith.constant 5.000000e-01 : f32
      %67 = vector.broadcast %cst_38 : f32 to vector<4x32xf32>
      %68 = arith.mulf %67, %66 : vector<4x32xf32>
      %cst_39 = arith.constant 5.000000e-01 : f32
      %69 = vector.broadcast %cst_39 : f32 to vector<4x32xf32>
      %70 = arith.addf %68, %69 : vector<4x32xf32>
      %71 = vector.extract_strided_slice %60 {offsets = [0, 64], sizes = [4, 32], strides = [1, 1]} : vector<4x128xf32> to vector<4x32xf32>
      %72 = vector.extract_strided_slice %60 {offsets = [0, 96], sizes = [4, 32], strides = [1, 1]} : vector<4x128xf32> to vector<4x32xf32>
      %cst_40 = arith.constant 5.000000e-01 : f32
      %73 = vector.broadcast %cst_40 : f32 to vector<4x32xf32>
      %74 = arith.mulf %73, %72 : vector<4x32xf32>
      %cst_41 = arith.constant 5.000000e-01 : f32
      %75 = vector.broadcast %cst_41 : f32 to vector<4x32xf32>
      %76 = arith.addf %74, %75 : vector<4x32xf32>
      %77 = arith.mulf %70, %48 : vector<4x32xf32>
      %78 = arith.mulf %65, %71 : vector<4x32xf32>
      %79 = arith.addf %77, %78 : vector<4x32xf32>
      %80 = math.tanh %79 : vector<4x32xf32>
      %81 = arith.mulf %76, %80 : vector<4x32xf32>
      %82 = arith.index_cast %c1_i32 : i32 to index
      %c0_42 = arith.constant 0 : index
      %c0_43 = arith.constant 0 : index
      %83 = vector.load %arg8[%82, %c0_42, %c0_43] : memref<8x4x32xf32, #tpu.memory_space<vmem>>, vector<1x4x32xf32>
      %84 = vector.shape_cast %83 : vector<1x4x32xf32> to vector<4x32xf32>
      %85 = vector.shape_cast %81 : vector<4x32xf32> to vector<1x4x32xf32>
      tpu.vector_store %arg8[%82, %c0_42, %c0_43], %85 {strides = array<i32>} : memref<8x4x32xf32, #tpu.memory_space<vmem>>, vector<1x4x32xf32>,
      %c2_i32 = arith.constant 2 : i32
      %cst_44 = arith.constant dense<0.000000e+00> : vector<4x128xf32>
      %86 = tpu.matmul %81, %12, %cst_44 {dimension_numbers = #tpu.dot_dimension_numbers<[1], [0], [0], [1], [0, 0, 1, 1], [], []>} : vector<4x32xf32>, vector<32x128xf32>, vector<4x128xf32> -> vector<4x128xf32>
      %87 = arith.index_cast %c2_i32 : i32 to index
      %c0_45 = arith.constant 0 : index
      %c0_46 = arith.constant 0 : index
      %88 = vector.load %arg11[%87, %c0_45, %c0_46] : memref<8x4x128xf32, #tpu.memory_space<vmem>>, vector<1x4x128xf32>
      %89 = vector.shape_cast %88 : vector<1x4x128xf32> to vector<4x128xf32>
      %90 = arith.addf %89, %86 : vector<4x128xf32>
      %91 = math.tanh %90 : vector<4x128xf32>
      %92 = vector.extract_strided_slice %91 {offsets = [0, 0], sizes = [4, 32], strides = [1, 1]} : vector<4x128xf32> to vector<4x32xf32>
      %cst_47 = arith.constant 5.000000e-01 : f32
      %93 = vector.broadcast %cst_47 : f32 to vector<4x32xf32>
      %94 = arith.mulf %93, %92 : vector<4x32xf32>
      %cst_48 = arith.constant 5.000000e-01 : f32
      %95 = vector.broadcast %cst_48 : f32 to vector<4x32xf32>
      %96 = arith.addf %94, %95 : vector<4x32xf32>
      %97 = vector.extract_strided_slice %91 {offsets = [0, 32], sizes = [4, 32], strides = [1, 1]} : vector<4x128xf32> to vector<4x32xf32>
      %cst_49 = arith.constant 5.000000e-01 : f32
      %98 = vector.broadcast %cst_49 : f32 to vector<4x32xf32>
      %99 = arith.mulf %98, %97 : vector<4x32xf32>
      %cst_50 = arith.constant 5.000000e-01 : f32
      %100 = vector.broadcast %cst_50 : f32 to vector<4x32xf32>
      %101 = arith.addf %99, %100 : vector<4x32xf32>
      %102 = vector.extract_strided_slice %91 {offsets = [0, 64], sizes = [4, 32], strides = [1, 1]} : vector<4x128xf32> to vector<4x32xf32>
      %103 = vector.extract_strided_slice %91 {offsets = [0, 96], sizes = [4, 32], strides = [1, 1]} : vector<4x128xf32> to vector<4x32xf32>
      %cst_51 = arith.constant 5.000000e-01 : f32
      %104 = vector.broadcast %cst_51 : f32 to vector<4x32xf32>
      %105 = arith.mulf %104, %103 : vector<4x32xf32>
      %cst_52 = arith.constant 5.000000e-01 : f32
      %106 = vector.broadcast %cst_52 : f32 to vector<4x32xf32>
      %107 = arith.addf %105, %106 : vector<4x32xf32>
      %108 = arith.mulf %101, %79 : vector<4x32xf32>
      %109 = arith.mulf %96, %102 : vector<4x32xf32>
      %110 = arith.addf %108, %109 : vector<4x32xf32>
      %111 = math.tanh %110 : vector<4x32xf32>
      %112 = arith.mulf %107, %111 : vector<4x32xf32>
      %113 = arith.index_cast %c2_i32 : i32 to index
      %c0_53 = arith.constant 0 : index
      %c0_54 = arith.constant 0 : index
      %114 = vector.load %arg8[%113, %c0_53, %c0_54] : memref<8x4x32xf32, #tpu.memory_space<vmem>>, vector<1x4x32xf32>
      %115 = vector.shape_cast %114 : vector<1x4x32xf32> to vector<4x32xf32>
      %116 = vector.shape_cast %112 : vector<4x32xf32> to vector<1x4x32xf32>
      tpu.vector_store %arg8[%113, %c0_53, %c0_54], %116 {strides = array<i32>} : memref<8x4x32xf32, #tpu.memory_space<vmem>>, vector<1x4x32xf32>,
      %c3_i32 = arith.constant 3 : i32
      %cst_55 = arith.constant dense<0.000000e+00> : vector<4x128xf32>
      %117 = tpu.matmul %112, %12, %cst_55 {dimension_numbers = #tpu.dot_dimension_numbers<[1], [0], [0], [1], [0, 0, 1, 1], [], []>} : vector<4x32xf32>, vector<32x128xf32>, vector<4x128xf32> -> vector<4x128xf32>
      %118 = arith.index_cast %c3_i32 : i32 to index
      %c0_56 = arith.constant 0 : index
      %c0_57 = arith.constant 0 : index
      %119 = vector.load %arg11[%118, %c0_56, %c0_57] : memref<8x4x128xf32, #tpu.memory_space<vmem>>, vector<1x4x128xf32>
      %120 = vector.shape_cast %119 : vector<1x4x128xf32> to vector<4x128xf32>
      %121 = arith.addf %120, %117 : vector<4x128xf32>
      %122 = math.tanh %121 : vector<4x128xf32>
      %123 = vector.extract_strided_slice %122 {offsets = [0, 0], sizes = [4, 32], strides = [1, 1]} : vector<4x128xf32> to vector<4x32xf32>
      %cst_58 = arith.constant 5.000000e-01 : f32
      %124 = vector.broadcast %cst_58 : f32 to vector<4x32xf32>
      %125 = arith.mulf %124, %123 : vector<4x32xf32>
      %cst_59 = arith.constant 5.000000e-01 : f32
      %126 = vector.broadcast %cst_59 : f32 to vector<4x32xf32>
      %127 = arith.addf %125, %126 : vector<4x32xf32>
      %128 = vector.extract_strided_slice %122 {offsets = [0, 32], sizes = [4, 32], strides = [1, 1]} : vector<4x128xf32> to vector<4x32xf32>
      %cst_60 = arith.constant 5.000000e-01 : f32
      %129 = vector.broadcast %cst_60 : f32 to vector<4x32xf32>
      %130 = arith.mulf %129, %128 : vector<4x32xf32>
      %cst_61 = arith.constant 5.000000e-01 : f32
      %131 = vector.broadcast %cst_61 : f32 to vector<4x32xf32>
      %132 = arith.addf %130, %131 : vector<4x32xf32>
      %133 = vector.extract_strided_slice %122 {offsets = [0, 64], sizes = [4, 32], strides = [1, 1]} : vector<4x128xf32> to vector<4x32xf32>
      %134 = vector.extract_strided_slice %122 {offsets = [0, 96], sizes = [4, 32], strides = [1, 1]} : vector<4x128xf32> to vector<4x32xf32>
      %cst_62 = arith.constant 5.000000e-01 : f32
      %135 = vector.broadcast %cst_62 : f32 to vector<4x32xf32>
      %136 = arith.mulf %135, %134 : vector<4x32xf32>
      %cst_63 = arith.constant 5.000000e-01 : f32
      %137 = vector.broadcast %cst_63 : f32 to vector<4x32xf32>
      %138 = arith.addf %136, %137 : vector<4x32xf32>
      %139 = arith.mulf %132, %110 : vector<4x32xf32>
      %140 = arith.mulf %127, %133 : vector<4x32xf32>
      %141 = arith.addf %139, %140 : vector<4x32xf32>
      %142 = math.tanh %141 : vector<4x32xf32>
      %143 = arith.mulf %138, %142 : vector<4x32xf32>
      %144 = arith.index_cast %c3_i32 : i32 to index
      %c0_64 = arith.constant 0 : index
      %c0_65 = arith.constant 0 : index
      %145 = vector.load %arg8[%144, %c0_64, %c0_65] : memref<8x4x32xf32, #tpu.memory_space<vmem>>, vector<1x4x32xf32>
      %146 = vector.shape_cast %145 : vector<1x4x32xf32> to vector<4x32xf32>
      %147 = vector.shape_cast %143 : vector<4x32xf32> to vector<1x4x32xf32>
      tpu.vector_store %arg8[%144, %c0_64, %c0_65], %147 {strides = array<i32>} : memref<8x4x32xf32, #tpu.memory_space<vmem>>, vector<1x4x32xf32>,
      %c4_i32 = arith.constant 4 : i32
      %cst_66 = arith.constant dense<0.000000e+00> : vector<4x128xf32>
      %148 = tpu.matmul %143, %12, %cst_66 {dimension_numbers = #tpu.dot_dimension_numbers<[1], [0], [0], [1], [0, 0, 1, 1], [], []>} : vector<4x32xf32>, vector<32x128xf32>, vector<4x128xf32> -> vector<4x128xf32>
      %149 = arith.index_cast %c4_i32 : i32 to index
      %c0_67 = arith.constant 0 : index
      %c0_68 = arith.constant 0 : index
      %150 = vector.load %arg11[%149, %c0_67, %c0_68] : memref<8x4x128xf32, #tpu.memory_space<vmem>>, vector<1x4x128xf32>
      %151 = vector.shape_cast %150 : vector<1x4x128xf32> to vector<4x128xf32>
      %152 = arith.addf %151, %148 : vector<4x128xf32>
      %153 = math.tanh %152 : vector<4x128xf32>
      %154 = vector.extract_strided_slice %153 {offsets = [0, 0], sizes = [4, 32], strides = [1, 1]} : vector<4x128xf32> to vector<4x32xf32>
      %cst_69 = arith.constant 5.000000e-01 : f32
      %155 = vector.broadcast %cst_69 : f32 to vector<4x32xf32>
      %156 = arith.mulf %155, %154 : vector<4x32xf32>
      %cst_70 = arith.constant 5.000000e-01 : f32
      %157 = vector.broadcast %cst_70 : f32 to vector<4x32xf32>
      %158 = arith.addf %156, %157 : vector<4x32xf32>
      %159 = vector.extract_strided_slice %153 {offsets = [0, 32], sizes = [4, 32], strides = [1, 1]} : vector<4x128xf32> to vector<4x32xf32>
      %cst_71 = arith.constant 5.000000e-01 : f32
      %160 = vector.broadcast %cst_71 : f32 to vector<4x32xf32>
      %161 = arith.mulf %160, %159 : vector<4x32xf32>
      %cst_72 = arith.constant 5.000000e-01 : f32
      %162 = vector.broadcast %cst_72 : f32 to vector<4x32xf32>
      %163 = arith.addf %161, %162 : vector<4x32xf32>
      %164 = vector.extract_strided_slice %153 {offsets = [0, 64], sizes = [4, 32], strides = [1, 1]} : vector<4x128xf32> to vector<4x32xf32>
      %165 = vector.extract_strided_slice %153 {offsets = [0, 96], sizes = [4, 32], strides = [1, 1]} : vector<4x128xf32> to vector<4x32xf32>
      %cst_73 = arith.constant 5.000000e-01 : f32
      %166 = vector.broadcast %cst_73 : f32 to vector<4x32xf32>
      %167 = arith.mulf %166, %165 : vector<4x32xf32>
      %cst_74 = arith.constant 5.000000e-01 : f32
      %168 = vector.broadcast %cst_74 : f32 to vector<4x32xf32>
      %169 = arith.addf %167, %168 : vector<4x32xf32>
      %170 = arith.mulf %163, %141 : vector<4x32xf32>
      %171 = arith.mulf %158, %164 : vector<4x32xf32>
      %172 = arith.addf %170, %171 : vector<4x32xf32>
      %173 = math.tanh %172 : vector<4x32xf32>
      %174 = arith.mulf %169, %173 : vector<4x32xf32>
      %175 = arith.index_cast %c4_i32 : i32 to index
      %c0_75 = arith.constant 0 : index
      %c0_76 = arith.constant 0 : index
      %176 = vector.load %arg8[%175, %c0_75, %c0_76] : memref<8x4x32xf32, #tpu.memory_space<vmem>>, vector<1x4x32xf32>
      %177 = vector.shape_cast %176 : vector<1x4x32xf32> to vector<4x32xf32>
      %178 = vector.shape_cast %174 : vector<4x32xf32> to vector<1x4x32xf32>
      tpu.vector_store %arg8[%175, %c0_75, %c0_76], %178 {strides = array<i32>} : memref<8x4x32xf32, #tpu.memory_space<vmem>>, vector<1x4x32xf32>,
      %c5_i32 = arith.constant 5 : i32
      %cst_77 = arith.constant dense<0.000000e+00> : vector<4x128xf32>
      %179 = tpu.matmul %174, %12, %cst_77 {dimension_numbers = #tpu.dot_dimension_numbers<[1], [0], [0], [1], [0, 0, 1, 1], [], []>} : vector<4x32xf32>, vector<32x128xf32>, vector<4x128xf32> -> vector<4x128xf32>
      %180 = arith.index_cast %c5_i32 : i32 to index
      %c0_78 = arith.constant 0 : index
      %c0_79 = arith.constant 0 : index
      %181 = vector.load %arg11[%180, %c0_78, %c0_79] : memref<8x4x128xf32, #tpu.memory_space<vmem>>, vector<1x4x128xf32>
      %182 = vector.shape_cast %181 : vector<1x4x128xf32> to vector<4x128xf32>
      %183 = arith.addf %182, %179 : vector<4x128xf32>
      %184 = math.tanh %183 : vector<4x128xf32>
      %185 = vector.extract_strided_slice %184 {offsets = [0, 0], sizes = [4, 32], strides = [1, 1]} : vector<4x128xf32> to vector<4x32xf32>
      %cst_80 = arith.constant 5.000000e-01 : f32
      %186 = vector.broadcast %cst_80 : f32 to vector<4x32xf32>
      %187 = arith.mulf %186, %185 : vector<4x32xf32>
      %cst_81 = arith.constant 5.000000e-01 : f32
      %188 = vector.broadcast %cst_81 : f32 to vector<4x32xf32>
      %189 = arith.addf %187, %188 : vector<4x32xf32>
      %190 = vector.extract_strided_slice %184 {offsets = [0, 32], sizes = [4, 32], strides = [1, 1]} : vector<4x128xf32> to vector<4x32xf32>
      %cst_82 = arith.constant 5.000000e-01 : f32
      %191 = vector.broadcast %cst_82 : f32 to vector<4x32xf32>
      %192 = arith.mulf %191, %190 : vector<4x32xf32>
      %cst_83 = arith.constant 5.000000e-01 : f32
      %193 = vector.broadcast %cst_83 : f32 to vector<4x32xf32>
      %194 = arith.addf %192, %193 : vector<4x32xf32>
      %195 = vector.extract_strided_slice %184 {offsets = [0, 64], sizes = [4, 32], strides = [1, 1]} : vector<4x128xf32> to vector<4x32xf32>
      %196 = vector.extract_strided_slice %184 {offsets = [0, 96], sizes = [4, 32], strides = [1, 1]} : vector<4x128xf32> to vector<4x32xf32>
      %cst_84 = arith.constant 5.000000e-01 : f32
      %197 = vector.broadcast %cst_84 : f32 to vector<4x32xf32>
      %198 = arith.mulf %197, %196 : vector<4x32xf32>
      %cst_85 = arith.constant 5.000000e-01 : f32
      %199 = vector.broadcast %cst_85 : f32 to vector<4x32xf32>
      %200 = arith.addf %198, %199 : vector<4x32xf32>
      %201 = arith.mulf %194, %172 : vector<4x32xf32>
      %202 = arith.mulf %189, %195 : vector<4x32xf32>
      %203 = arith.addf %201, %202 : vector<4x32xf32>
      %204 = math.tanh %203 : vector<4x32xf32>
      %205 = arith.mulf %200, %204 : vector<4x32xf32>
      %206 = arith.index_cast %c5_i32 : i32 to index
      %c0_86 = arith.constant 0 : index
      %c0_87 = arith.constant 0 : index
      %207 = vector.load %arg8[%206, %c0_86, %c0_87] : memref<8x4x32xf32, #tpu.memory_space<vmem>>, vector<1x4x32xf32>
      %208 = vector.shape_cast %207 : vector<1x4x32xf32> to vector<4x32xf32>
      %209 = vector.shape_cast %205 : vector<4x32xf32> to vector<1x4x32xf32>
      tpu.vector_store %arg8[%206, %c0_86, %c0_87], %209 {strides = array<i32>} : memref<8x4x32xf32, #tpu.memory_space<vmem>>, vector<1x4x32xf32>,
      %c6_i32 = arith.constant 6 : i32
      %cst_88 = arith.constant dense<0.000000e+00> : vector<4x128xf32>
      %210 = tpu.matmul %205, %12, %cst_88 {dimension_numbers = #tpu.dot_dimension_numbers<[1], [0], [0], [1], [0, 0, 1, 1], [], []>} : vector<4x32xf32>, vector<32x128xf32>, vector<4x128xf32> -> vector<4x128xf32>
      %211 = arith.index_cast %c6_i32 : i32 to index
      %c0_89 = arith.constant 0 : index
      %c0_90 = arith.constant 0 : index
      %212 = vector.load %arg11[%211, %c0_89, %c0_90] : memref<8x4x128xf32, #tpu.memory_space<vmem>>, vector<1x4x128xf32>
      %213 = vector.shape_cast %212 : vector<1x4x128xf32> to vector<4x128xf32>
      %214 = arith.addf %213, %210 : vector<4x128xf32>
      %215 = math.tanh %214 : vector<4x128xf32>
      %216 = vector.extract_strided_slice %215 {offsets = [0, 0], sizes = [4, 32], strides = [1, 1]} : vector<4x128xf32> to vector<4x32xf32>
      %cst_91 = arith.constant 5.000000e-01 : f32
      %217 = vector.broadcast %cst_91 : f32 to vector<4x32xf32>
      %218 = arith.mulf %217, %216 : vector<4x32xf32>
      %cst_92 = arith.constant 5.000000e-01 : f32
      %219 = vector.broadcast %cst_92 : f32 to vector<4x32xf32>
      %220 = arith.addf %218, %219 : vector<4x32xf32>
      %221 = vector.extract_strided_slice %215 {offsets = [0, 32], sizes = [4, 32], strides = [1, 1]} : vector<4x128xf32> to vector<4x32xf32>
      %cst_93 = arith.constant 5.000000e-01 : f32
      %222 = vector.broadcast %cst_93 : f32 to vector<4x32xf32>
      %223 = arith.mulf %222, %221 : vector<4x32xf32>
      %cst_94 = arith.constant 5.000000e-01 : f32
      %224 = vector.broadcast %cst_94 : f32 to vector<4x32xf32>
      %225 = arith.addf %223, %224 : vector<4x32xf32>
      %226 = vector.extract_strided_slice %215 {offsets = [0, 64], sizes = [4, 32], strides = [1, 1]} : vector<4x128xf32> to vector<4x32xf32>
      %227 = vector.extract_strided_slice %215 {offsets = [0, 96], sizes = [4, 32], strides = [1, 1]} : vector<4x128xf32> to vector<4x32xf32>
      %cst_95 = arith.constant 5.000000e-01 : f32
      %228 = vector.broadcast %cst_95 : f32 to vector<4x32xf32>
      %229 = arith.mulf %228, %227 : vector<4x32xf32>
      %cst_96 = arith.constant 5.000000e-01 : f32
      %230 = vector.broadcast %cst_96 : f32 to vector<4x32xf32>
      %231 = arith.addf %229, %230 : vector<4x32xf32>
      %232 = arith.mulf %225, %203 : vector<4x32xf32>
      %233 = arith.mulf %220, %226 : vector<4x32xf32>
      %234 = arith.addf %232, %233 : vector<4x32xf32>
      %235 = math.tanh %234 : vector<4x32xf32>
      %236 = arith.mulf %231, %235 : vector<4x32xf32>
      %237 = arith.index_cast %c6_i32 : i32 to index
      %c0_97 = arith.constant 0 : index
      %c0_98 = arith.constant 0 : index
      %238 = vector.load %arg8[%237, %c0_97, %c0_98] : memref<8x4x32xf32, #tpu.memory_space<vmem>>, vector<1x4x32xf32>
      %239 = vector.shape_cast %238 : vector<1x4x32xf32> to vector<4x32xf32>
      %240 = vector.shape_cast %236 : vector<4x32xf32> to vector<1x4x32xf32>
      tpu.vector_store %arg8[%237, %c0_97, %c0_98], %240 {strides = array<i32>} : memref<8x4x32xf32, #tpu.memory_space<vmem>>, vector<1x4x32xf32>,
      %c7_i32 = arith.constant 7 : i32
      %cst_99 = arith.constant dense<0.000000e+00> : vector<4x128xf32>
      %241 = tpu.matmul %236, %12, %cst_99 {dimension_numbers = #tpu.dot_dimension_numbers<[1], [0], [0], [1], [0, 0, 1, 1], [], []>} : vector<4x32xf32>, vector<32x128xf32>, vector<4x128xf32> -> vector<4x128xf32>
      %242 = arith.index_cast %c7_i32 : i32 to index
      %c0_100 = arith.constant 0 : index
      %c0_101 = arith.constant 0 : index
      %243 = vector.load %arg11[%242, %c0_100, %c0_101] : memref<8x4x128xf32, #tpu.memory_space<vmem>>, vector<1x4x128xf32>
      %244 = vector.shape_cast %243 : vector<1x4x128xf32> to vector<4x128xf32>
      %245 = arith.addf %244, %241 : vector<4x128xf32>
      %246 = math.tanh %245 : vector<4x128xf32>
      %247 = vector.extract_strided_slice %246 {offsets = [0, 0], sizes = [4, 32], strides = [1, 1]} : vector<4x128xf32> to vector<4x32xf32>
      %cst_102 = arith.constant 5.000000e-01 : f32
      %248 = vector.broadcast %cst_102 : f32 to vector<4x32xf32>
      %249 = arith.mulf %248, %247 : vector<4x32xf32>
      %cst_103 = arith.constant 5.000000e-01 : f32
      %250 = vector.broadcast %cst_103 : f32 to vector<4x32xf32>
      %251 = arith.addf %249, %250 : vector<4x32xf32>
      %252 = vector.extract_strided_slice %246 {offsets = [0, 32], sizes = [4, 32], strides = [1, 1]} : vector<4x128xf32> to vector<4x32xf32>
      %cst_104 = arith.constant 5.000000e-01 : f32
      %253 = vector.broadcast %cst_104 : f32 to vector<4x32xf32>
      %254 = arith.mulf %253, %252 : vector<4x32xf32>
      %cst_105 = arith.constant 5.000000e-01 : f32
      %255 = vector.broadcast %cst_105 : f32 to vector<4x32xf32>
      %256 = arith.addf %254, %255 : vector<4x32xf32>
      %257 = vector.extract_strided_slice %246 {offsets = [0, 64], sizes = [4, 32], strides = [1, 1]} : vector<4x128xf32> to vector<4x32xf32>
      %258 = vector.extract_strided_slice %246 {offsets = [0, 96], sizes = [4, 32], strides = [1, 1]} : vector<4x128xf32> to vector<4x32xf32>
      %cst_106 = arith.constant 5.000000e-01 : f32
      %259 = vector.broadcast %cst_106 : f32 to vector<4x32xf32>
      %260 = arith.mulf %259, %258 : vector<4x32xf32>
      %cst_107 = arith.constant 5.000000e-01 : f32
      %261 = vector.broadcast %cst_107 : f32 to vector<4x32xf32>
      %262 = arith.addf %260, %261 : vector<4x32xf32>
      %263 = arith.mulf %256, %234 : vector<4x32xf32>
      %264 = arith.mulf %251, %257 : vector<4x32xf32>
      %265 = arith.addf %263, %264 : vector<4x32xf32>
      %266 = math.tanh %265 : vector<4x32xf32>
      %267 = arith.mulf %262, %266 : vector<4x32xf32>
      %268 = arith.index_cast %c7_i32 : i32 to index
      %c0_108 = arith.constant 0 : index
      %c0_109 = arith.constant 0 : index
      %269 = vector.load %arg8[%268, %c0_108, %c0_109] : memref<8x4x32xf32, #tpu.memory_space<vmem>>, vector<1x4x32xf32>
      %270 = vector.shape_cast %269 : vector<1x4x32xf32> to vector<4x32xf32>
      %271 = vector.shape_cast %267 : vector<4x32xf32> to vector<1x4x32xf32>
      tpu.vector_store %arg8[%268, %c0_108, %c0_109], %271 {strides = array<i32>} : memref<8x4x32xf32, #tpu.memory_space<vmem>>, vector<1x4x32xf32>,
      %c8_i32_110 = arith.constant 8 : i32
      %c0_111 = arith.constant 0 : index
      %c0_112 = arith.constant 0 : index
      %272 = vector.load %arg12[%c0_111, %c0_112] : memref<4x32xf32, #tpu.memory_space<vmem>>, vector<4x32xf32>
      tpu.vector_store %arg12[%c0_111, %c0_112], %267 {strides = array<i32>} : memref<4x32xf32, #tpu.memory_space<vmem>>, vector<4x32xf32>,
      %c0_113 = arith.constant 0 : index
      %c0_114 = arith.constant 0 : index
      %273 = vector.load %arg13[%c0_113, %c0_114] : memref<4x32xf32, #tpu.memory_space<vmem>>, vector<4x32xf32>
      tpu.vector_store %arg13[%c0_113, %c0_114], %265 {strides = array<i32>} : memref<4x32xf32, #tpu.memory_space<vmem>>, vector<4x32xf32>,
      %274 = tpu.iota {dimensions = array<i32: 0>} : vector<8x4x32xi32>
      %275 = vector.broadcast %0 : i32 to vector<8x4x32xi32>
      %276 = arith.addi %275, %274 : vector<8x4x32xi32>
      %277 = vector.shape_cast %11 : vector<4x1xi32> to vector<1x4x1xi32>
      %278 = vector.broadcast %277 : vector<1x4x1xi32> to vector<8x4x32xi32>
      %279 = arith.cmpi slt, %276, %278 : vector<8x4x32xi32>
      %280 = arith.extui %279 : vector<8x4x32xi1> to vector<8x4x32xi32>
      %281 = arith.sitofp %280 : vector<8x4x32xi32> to vector<8x4x32xf32>
      %c0_115 = arith.constant 0 : index
      %c0_116 = arith.constant 0 : index
      %c0_117 = arith.constant 0 : index
      %282 = vector.load %arg8[%c0_115, %c0_116, %c0_117] : memref<8x4x32xf32, #tpu.memory_space<vmem>>, vector<8x4x32xf32>
      %283 = arith.mulf %282, %281 : vector<8x4x32xf32>
      %c0_118 = arith.constant 0 : index
      %c0_119 = arith.constant 0 : index
      %c0_120 = arith.constant 0 : index
      %284 = vector.load %arg8[%c0_118, %c0_119, %c0_120] : memref<8x4x32xf32, #tpu.memory_space<vmem>>, vector<8x4x32xf32>
      tpu.vector_store %arg8[%c0_118, %c0_119, %c0_120], %283 {strides = array<i32>} : memref<8x4x32xf32, #tpu.memory_space<vmem>>, vector<8x4x32xf32>,
    } else {
    }
    %8 = arith.cmpi sge, %0, %4 : i32
    %9 = arith.extui %8 : i1 to i32
    %c0_i32_2 = arith.constant 0 : i32
    %10 = arith.cmpi ne, %9, %c0_i32_2 : i32
    scf.if %10 {
      %cst = arith.constant 0.000000e+00 : f32
      %11 = vector.broadcast %cst : f32 to vector<8x4x32xf32>
      %c0_3 = arith.constant 0 : index
      %c0_4 = arith.constant 0 : index
      %c0_5 = arith.constant 0 : index
      %12 = vector.load %arg8[%c0_3, %c0_4, %c0_5] : memref<8x4x32xf32, #tpu.memory_space<vmem>>, vector<8x4x32xf32>
      tpu.vector_store %arg8[%c0_3, %c0_4, %c0_5], %11 {strides = array<i32>} : memref<8x4x32xf32, #tpu.memory_space<vmem>>, vector<8x4x32xf32>,
    } else {
    }
    return
  }
  func.func @transform_0(%arg0: i32, %arg1: i32, %arg2: memref<1xi32, #tpu.memory_space<smem>>) -> (i32, i32) {
    %c0_i32 = arith.constant 0 : i32
    %c0_i32_0 = arith.constant 0 : i32
    return %arg0, %c0_i32 : i32, i32
  }
  func.func @transform_1(%arg0: i32, %arg1: i32, %arg2: memref<1xi32, #tpu.memory_space<smem>>) -> (i32, i32, i32) {
    %c0_i32 = arith.constant 0 : i32
    %c0_i32_0 = arith.constant 0 : i32
    return %arg1, %arg0, %c0_i32 : i32, i32, i32
  }
  func.func @transform_2(%arg0: i32, %arg1: i32, %arg2: memref<1xi32, #tpu.memory_space<smem>>) -> (i32, i32) {
    %c0_i32 = arith.constant 0 : i32
    %c0_i32_0 = arith.constant 0 : i32
    %c0_i32_1 = arith.constant 0 : i32
    return %c0_i32, %c0_i32_0 : i32, i32
  }
  func.func @transform_5(%arg0: i32, %arg1: i32, %arg2: memref<1xi32, #tpu.memory_space<smem>>) -> (i32, i32, i32) {
    %c0_i32 = arith.constant 0 : i32
    %c0_i32_0 = arith.constant 0 : i32
    return %arg1, %arg0, %c0_i32 : i32, i32, i32
  }
}

</mosaic_0001>

<bundles_post_ra>
// kernel: tpu_custom_call.1
= control target key start
LH: loop header
LB: loop body
LE: loop exit
PB: predicated region body
PF: predicated region fallthrough
CT: control target
= control target key end

     0   :  { %12 = vsyncpa [#allocation10], 0  ;;  %s1076_s0 = inlined_call_operand.<no memory space> [shape: s32[1], index: 0, kind: input, shape index: {}]   ;;  %s1077_s1 = inlined_call_operand.vmem [shape: s32[4,1], index: 1, kind: input, shape index: {}]   ;;  %s1078_s2 = inlined_call_operand.hbm [shape: f32[8,4,16], index: 2, kind: input, shape index: {}]   ;;  %s1079_s3 = inlined_call_operand.vmem [shape: f32[1,128], index: 3, kind: input, shape index: {}]   ;;  %s1080_s4 = inlined_call_operand.hbm [shape: f32[16,128], index: 4, kind: input, shape index: {}]   ;;  %s1081_s5 = inlined_call_operand.hbm [shape: f32[32,128], index: 5, kind: input, shape index: {}]   ;;  %s1082_s6 = inlined_call_operand.hbm [shape: f32[8,4,32], index: 6, kind: output, shape index: {}]  }
   0x1   :  { %13 = vsyncpa [#allocation11], 0  ;;  %s20_s23 = sshll.u32 %s1078_s2, 4  ;;  %s879_s24 = smov [#allocation9]   ;;  %s21_s23 = int_to_ptr.hbm [resolvable:$true] %s20_s23 }
   0x2   :  { %s22_s25 = sshll.u32 %s879_s24, 4  ;;  %s880_s26 = smov 64   ;;  %s23_s25 = int_to_ptr.vmem [resolvable:$true] %s22_s25 }
   0x3   :  { %s881_s27 = smov 4  }
   0x4   :  { %28 = dma.hbm_to_vmem [thread:$0]  %s21_s23, 512, %s23_s25, [#allocation10], %s880_s26, %s880_s26, %s881_s27  }
   0x5   :  { %871 = dma.done.wait [#allocation10], 512  }
   0x6   :  { %872 = vsyncadd [#allocation10], 4294966784 }
   0x7   :  { %s47_s30 = sshll.u32 %s1080_s4, 4  ;;  %s882_s7 = smov [#allocation2]   ;;  %s48_s30 = int_to_ptr.hbm [resolvable:$true] %s47_s30 }
   0x8   :  { %s49_s8 = sshll.u32 %s882_s7, 4  ;;  %s50_s8 = int_to_ptr.vmem [resolvable:$true] %s49_s8 }
   0x9   :  { %52 = dma.hbm_to_vmem [thread:$0]  %s48_s30, 256, %s50_s8, [#allocation13] }
   0xa   :  { %873 = dma.done.wait [#allocation13], 256 }
   0xb   :  { %874 = vsyncadd [#allocation13], 4294967040 }
   0xc   :  { %s63_s10 = sshll.u32 %s1081_s5, 4  ;;  %s883_s11 = smov [#allocation3]   ;;  %s64_s10 = int_to_ptr.hbm [resolvable:$true] %s63_s10 }
   0xd   :  { %s65_s12 = sshll.u32 %s883_s11, 4  ;;  %s66_s12 = int_to_ptr.vmem [resolvable:$true] %s65_s12 }
   0xe   :  { %68 = dma.hbm_to_vmem [thread:$0]  %s64_s10, 512, %s66_s12, [#allocation18] }
   0xf   :  { %875 = dma.done.wait [#allocation18], 512 }
  0x10   :  { %876 = vsyncadd [#allocation18], 4294966784  ;;  %vm72_vm0 = vcmask 257024   ;;  %v884_v0 = vmov 0.0   ;;  %p697_p0 = scmp.le.s32.totalorder %s1076_s0, 0 }
  0x11   :  { %73 = vst.msk [vmem:[#allocation5] sm:$0xf] %vm72_vm0, %v884_v0  ;;  %s885_s15 = smov (!%p697_p0), 64   ;;  %s886_s16 = smov (!%p697_p0), 32  }
  0x12   :  { %74 = vst.msk [vmem:[#allocation6] sm:$0xf] %vm72_vm0, %v884_v0  ;;  %79 = sbr.rel (%p697_p0) target bundleno = 4684 (0x124c), region = 35 }
  0x17   :  { %v94_v1 = vld [vmem:[#allocation2 + $0x8] sm:$0xff]  ;;  %v93_v2 = vld [vmem:[#allocation2] sm:$0xff]  ;;  %v85_v3 = vld [vmem:[#allocation9] sm:$0xf]  ;;  %vm186_vm1 = vcmask 261120   ;;  %vm126_vm2 = vcmask 130048  }
  0x18   :  { %149 = vmatpush.msra.mxu0 %v94_v1  ;;  %v86_v4 = vld [vmem:[#allocation9 + $0x4] sm:$0xf]  ;;  %107 = vst [vmem:[#allocation1] ss:$2 sm:$0xff] %v85_v3  ;;  %v944_v5 = vld [vmem:[#allocation3 + $0x18] sm:$0xff]  ;;  %v946_v6 = vld [vmem:[#allocation3 + $0x10] sm:$0xff] }
  0x19   :  { %109 = vst [vmem:[#allocation1 + $0x1] ss:$2 sm:$0xff] %v86_v4  ;;  %202 = vmatpush.msra.mxu1 %v944_v5  ;;  %256 = vmatpush.msra.mxu2 %v944_v5  ;;  %v950_v7 = vld [vmem:[#allocation3 + $0x8] sm:$0xff]  ;;  %v955_v8 = vld [vmem:[#allocation3] sm:$0xff]  ;;  %v87_v44 = vld [vmem:[#allocation9 + $0x8] sm:$0xf] }
  0x1a   :  { %150 = vmatpush.msra.mxu0 %v93_v2  ;;  %307 = vmatpush.msra.mxu3 %v944_v5  ;;  %v184_v9 = vld [vmem:[#allocation5] sm:$0xf]  ;;  %v985_v11 = vld [vmem:[%s1079_s3] ss:$0 sm:$0xff]  ;;  %v185_v19 = vld [vmem:[#allocation6] sm:$0xf] }
  0x1b   :  { %203 = vmatpush.msra.mxu1 %v946_v6  ;;  %257 = vmatpush.msra.mxu2 %v946_v6  ;;  %v88_v45 = vld [vmem:[#allocation9 + $0xc] sm:$0xf]  ;;  %111 = vst [vmem:[#allocation1 + $0x10] ss:$2 sm:$0xff] %v87_v44 }
  0x1c   :  { %308 = vmatpush.msra.mxu3 %v946_v6  ;;  %113 = vst [vmem:[#allocation1 + $0x11] ss:$2 sm:$0xff] %v88_v45 }
  0x1d   :  { %204 = vmatpush.msra.mxu1 %v950_v7  ;;  %258 = vmatpush.msra.mxu2 %v950_v7 }
  0x1e   :  { %309 = vmatpush.msra.mxu3 %v950_v7 }
  0x1f   :  { %205 = vmatpush.msra.mxu1 %v955_v8  ;;  %259 = vmatpush.msra.mxu2 %v955_v8 }
  0x20   :  { %v122_v10 = vld.sshfl [vmem:[#allocation1] sm:$0xff pattern:$0x75316420]  ;;  %702 = vmatmul.msk.f32.vlgmr.msra.gmra.mxu1 %vm186_vm1, %v184_v9  ;;  %310 = vmatpush.msra.mxu3 %v955_v8 }
  0x21   :  { %698 = vmatmul.msk.f32.vlgmr.msra.gmra.mxu0 %vm126_vm2, %v122_v10  ;;  %358 = vmatpush.msrb.mxu1 %v944_v5 }
  0x22   :  { %409 = vmatpush.msrb.mxu2 %v944_v5  ;;  %460 = vmatpush.msrb.mxu3 %v944_v5 }
  0x23   :  { %359 = vmatpush.msrb.mxu1 %v946_v6  ;;  %v123_v46 = vld.sshfl [vmem:[#allocation1 + $0x10] sm:$0xff pattern:$0x75316420] }
  0x24   :  { %410 = vmatpush.msrb.mxu2 %v946_v6  ;;  %461 = vmatpush.msrb.mxu3 %v946_v6 }
  0x25   :  { %360 = vmatpush.msrb.mxu1 %v950_v7 }
  0x26   :  { %411 = vmatpush.msrb.mxu2 %v950_v7  ;;  %462 = vmatpush.msrb.mxu3 %v950_v7 }
  0x27   :  { %361 = vmatpush.msrb.mxu1 %v955_v8 }
  0x28   :  { %412 = vmatpush.msrb.mxu2 %v955_v8  ;;  %463 = vmatpush.msrb.mxu3 %v955_v8 }
  0x29   :  { %511 = vmatpush.msra.mxu1 %v944_v5  ;;  %699 = vmatmul.msk.f32.gmra.mxu0 %vm126_vm2, %v123_v46 }
  0x2b   :  { %512 = vmatpush.msra.mxu1 %v946_v6 }
  0x2d   :  { %513 = vmatpush.msra.mxu1 %v950_v7 }
  0x2f   :  { %514 = vmatpush.msra.mxu1 %v955_v8 }
  0x9d   :  { %v207_v15 = vpop.f32.mrf.mxu1 }
  0x9e   :  { %v152_v12 = vpop.f32.mrf.mxu0 }
  0x9f   :  { %v153_v13 = vadd.f32 %v985_v11, %v152_v12 }
  0xa1   :  { %v168_v14 = vrot.slane %v153_v13, 4  ;;  %176 = vst [vmem:[#allocation4] sm:$0xf] %v153_v13 }
  0xa3   :  { %177 = vst [vmem:[#allocation4 + $0x4] sm:$0xf] %v168_v14 }
  0xa6   :  { %v155_v50 = vpop.f32.mrf.mxu0 }
  0xa7   :  { %v156_v51 = vadd.f32 %v985_v11, %v155_v50 }
  0xa8   :  { %v210_v16 = vld [vmem:[#allocation4] sm:$0xf] }
  0xa9   :  { %v211_v17 = vadd.f32 %v210_v16, %v207_v15  ;;  %v169_v52 = vrot.slane %v156_v51, 4  ;;  %178 = vst [vmem:[#allocation4 + $0x8] sm:$0xf] %v156_v51 }
  0xaa   :  { %v265_v33 = vld [vmem:[#allocation4 + $0x4] sm:$0xf] }
  0xab   :  { %743 = vtanh.f32 %v211_v17  ;;  %179 = vst [vmem:[#allocation4 + $0xc] sm:$0xf] %v169_v52  ;;  %v89_v17 = vld [vmem:[#allocation9 + $0x10] sm:$0xf] }
  0xac   :  { %115 = vst [vmem:[#allocation1 + $0x20] ss:$2 sm:$0xff] %v89_v17  ;;  %v887_v17 = vmov 0  }
  0xad   :  { %741 = vset.pattern.permute.xlu0 %v887_v17 }
  0xb0   :  { %v316_v53 = vld [vmem:[#allocation4 + $0x8] sm:$0xf] }
  0xb1   :  { %v744_v18 = vpop.eup %743 }
  0xb2   :  { %221 = vrot.lane.b32.xlu0 %v744_v18, %s885_s15  ;;  %v213_v20 = vmul.f32 0.5, %v744_v18  ;;  %v90_v18 = vld [vmem:[#allocation9 + $0x14] sm:$0xf] }
  0xb3   :  { %117 = vst [vmem:[#allocation1 + $0x21] ss:$2 sm:$0xff] %v90_v18 }
  0xb4   :  { %v214_v21 = vadd.f32 0.5, %v213_v20 }
  0xba   :  { %216 = vrot.lane.b32.xlu0 %v185_v19, %s886_s16  ;;  %v124_v19 = vld.sshfl [vmem:[#allocation1 + $0x20] sm:$0xff pattern:$0x75316420] }
  0xbb   :  { %700 = vmatmul.msk.f32.gmra.mxu0 %vm126_vm2, %v124_v19 }
 0x124   :  { %v222_v22 = vpop.permute.xlu0 %221 }
 0x125   :  { %v224_v23 = vmul.f32 %v222_v22, %v214_v21 }
 0x127   :  { %226 = vrot.lane.b32.xlu1 %v224_v23, %s886_s16 }
 0x12c   :  { %v217_v24 = vpop.permute.xlu0 %216 }
 0x12d   :  { %v219_v25 = vmul.f32 %v217_v24, %v214_v21 }
 0x138   :  { %v158_v22 = vpop.f32.mrf.mxu0 }
 0x139   :  { %v159_v23 = vadd.f32 %v985_v11, %v158_v22  ;;  %v80_v22 = vld [vmem:[%s1077_s1] sm:$0xf]  ;;  %s889_s1 = smov 96  }
 0x13b   :  { %v170_v24 = vrot.slane %v159_v23, 4  ;;  %180 = vst [vmem:[#allocation4 + $0x10] sm:$0xf] %v159_v23 }
 0x13d   :  { %181 = vst [vmem:[#allocation4 + $0x14] sm:$0xf] %v170_v24 }
 0x199   :  { %v227_v26 = vpop.permute.xlu1 %226 }
 0x19a   :  { %v229_v27 = vadd.f32 %v227_v26, %v219_v25  ;;  %v418_v26 = vld [vmem:[#allocation4 + $0x10] sm:$0xf] }
 0x19c   :  { %745 = vtanh.f32 %v229_v27 }
 0x1a2   :  { %v746_v28 = vpop.eup %745 }
 0x1a3   :  { %232 = vrot.lane.b32.xlu1 %v746_v28, %s885_s15 }
 0x215   :  { %v233_v29 = vpop.permute.xlu1 %232 }
 0x216   :  { %v235_v30 = vmul.f32 %v233_v29, %v214_v21 }
 0x218   :  { %237 = vrot.lane.b32.xlu2 %v235_v30, %s886_s16 }
 0x272   :  { %v238_v31 = vpop.permute.xlu2 %237 }
 0x273   :  { %241 = vst.msk [vmem:[#allocation12] sm:$0xf] %vm72_vm0, %v238_v31  ;;  %703 = vmatmul.msk.f32.vlgmr.msra.gmra.mxu2 %vm186_vm1, %v238_v31 }
 0x274   :  { %562 = vmatpush.msra.mxu2 %v944_v5  ;;  %v367_v5 = vld [vmem:[#allocation4 + $0xc] sm:$0xf] }
 0x276   :  { %563 = vmatpush.msra.mxu2 %v946_v6 }
 0x278   :  { %564 = vmatpush.msra.mxu2 %v950_v7 }
 0x27a   :  { %565 = vmatpush.msra.mxu2 %v955_v8 }
 0x2f6   :  { %v261_v32 = vpop.f32.mrf.mxu2 }
 0x2f7   :  { %v266_v34 = vadd.f32 %v265_v33, %v261_v32 }
 0x2f9   :  { %747 = vtanh.f32 %v266_v34 }
 0x2ff   :  { %v748_v35 = vpop.eup %747 }
 0x300   :  { %272 = vrot.lane.b32.xlu2 %v748_v35, %s885_s15  ;;  %v268_v36 = vmul.f32 0.5, %v748_v35 }
 0x302   :  { %v269_v37 = vadd.f32 0.5, %v268_v36 }
 0x304   :  { %v270_v40 = vmul.f32 %v269_v37, %v229_v27 }
 0x35a   :  { %v273_v38 = vpop.permute.xlu2 %272 }
 0x35b   :  { %v275_v39 = vmul.f32 %v273_v38, %v269_v37 }
 0x35d   :  { %277 = vrot.lane.b32.xlu0 %v275_v39, %s886_s16 }
 0x3cf   :  { %v278_v41 = vpop.permute.xlu0 %277 }
 0x3d0   :  { %v280_v42 = vadd.f32 %v278_v41, %v270_v40 }
 0x3d2   :  { %749 = vtanh.f32 %v280_v42 }
 0x3d8   :  { %v750_v43 = vpop.eup %749 }
 0x3d9   :  { %283 = vrot.lane.b32.xlu1 %v750_v43, %s885_s15 }
 0x44b   :  { %v284_v47 = vpop.permute.xlu1 %283 }
 0x44c   :  { %v286_v48 = vmul.f32 %v284_v47, %v269_v37 }
 0x44e   :  { %288 = vrot.lane.b32.xlu2 %v286_v48, %s886_s16 }
 0x4a8   :  { %v289_v49 = vpop.permute.xlu2 %288 }
 0x4a9   :  { %292 = vst.msk [vmem:[#allocation12 + $0x4] sm:$0xf] %vm72_vm0, %v289_v49  ;;  %704 = vmatmul.msk.f32.vlgmr.msra.gmra.mxu3 %vm186_vm1, %v289_v49 }
 0x52c   :  { %v312_v54 = vpop.f32.mrf.mxu3 }
 0x52d   :  { %v317_v55 = vadd.f32 %v316_v53, %v312_v54  ;;  %v91_v53 = vld [vmem:[#allocation9 + $0x18] sm:$0xf]  ;;  %v92_v54 = vld [vmem:[#allocation9 + $0x1c] sm:$0xf] }
 0x52e   :  { %119 = vst [vmem:[#allocation1 + $0x30] ss:$2 sm:$0xff] %v91_v53 }
 0x52f   :  { %751 = vtanh.f32 %v317_v55  ;;  %121 = vst [vmem:[#allocation1 + $0x31] ss:$2 sm:$0xff] %v92_v54 }
 0x535   :  { %v752_v56 = vpop.eup %751 }
 0x536   :  { %323 = vrot.lane.b32.xlu0 %v752_v56, %s885_s15  ;;  %v319_v57 = vmul.f32 0.5, %v752_v56  ;;  %v125_v55 = vld.sshfl [vmem:[#allocation1 + $0x30] sm:$0xff pattern:$0x75316420] }
 0x537   :  { %701 = vmatmul.msk.f32.gmra.mxu0 %vm126_vm2, %v125_v55 }
 0x538   :  { %v320_v58 = vadd.f32 0.5, %v319_v57 }
 0x53a   :  { %v321_v61 = vmul.f32 %v320_v58, %v280_v42  ;;  %v469_v42 = vld [vmem:[#allocation4 + $0x14] sm:$0xf] }
 0x5a8   :  { %v324_v59 = vpop.permute.xlu0 %323 }
 0x5a9   :  { %v326_v60 = vmul.f32 %v324_v59, %v320_v58 }
 0x5ab   :  { %328 = vrot.lane.b32.xlu1 %v326_v60, %s886_s16 }
 0x61d   :  { %v329_v62 = vpop.permute.xlu1 %328 }
 0x61e   :  { %v331_v63 = vadd.f32 %v329_v62, %v321_v61 }
 0x620   :  { %753 = vtanh.f32 %v331_v63 }
 0x626   :  { %v754_v0 = vpop.eup %753 }
 0x627   :  { %334 = vrot.lane.b32.xlu2 %v754_v0, %s885_s15 }
 0x681   :  { %v335_v1 = vpop.permute.xlu2 %334 }
 0x682   :  { %v337_v2 = vmul.f32 %v335_v1, %v320_v58  ;;  %v161_v58 = vpop.f32.mrf.mxu0 }
 0x683   :  { %v162_v59 = vadd.f32 %v985_v11, %v161_v58 }
 0x684   :  { %339 = vrot.lane.b32.xlu0 %v337_v2, %s886_s16 }
 0x685   :  { %v171_v60 = vrot.slane %v162_v59, 4  ;;  %182 = vst [vmem:[#allocation4 + $0x18] sm:$0xf] %v162_v59 }
 0x687   :  { %183 = vst [vmem:[#allocation4 + $0x1c] sm:$0xf] %v171_v60 }
 0x68c   :  { %v520_v62 = vld [vmem:[#allocation4 + $0x18] sm:$0xf] }
 0x6f6   :  { %v340_v3 = vpop.permute.xlu0 %339 }
 0x6f7   :  { %343 = vst.msk [vmem:[#allocation12 + $0x8] sm:$0xf] %vm72_vm0, %v340_v3  ;;  %705 = vmatmul.msk.f32.vlgmr.msrb.gmra.mxu1 %vm186_vm1, %v340_v3 }
 0x774   :  { %v363_v4 = vpop.f32.mrf.mxu1 }
 0x775   :  { %v368_v6 = vadd.f32 %v367_v5, %v363_v4 }
 0x777   :  { %755 = vtanh.f32 %v368_v6 }
 0x77d   :  { %v756_v7 = vpop.eup %755 }
 0x77e   :  { %374 = vrot.lane.b32.xlu1 %v756_v7, %s885_s15  ;;  %v370_v8 = vmul.f32 0.5, %v756_v7 }
 0x780   :  { %v371_v9 = vadd.f32 0.5, %v370_v8 }
 0x782   :  { %v372_v13 = vmul.f32 %v371_v9, %v331_v63 }
 0x7f0   :  { %v375_v10 = vpop.permute.xlu1 %374 }
 0x7f1   :  { %v377_v12 = vmul.f32 %v375_v10, %v371_v9 }
 0x7f3   :  { %379 = vrot.lane.b32.xlu2 %v377_v12, %s886_s16 }
 0x84d   :  { %v380_v14 = vpop.permute.xlu2 %379 }
 0x84e   :  { %v382_v15 = vadd.f32 %v380_v14, %v372_v13  ;;  %v571_v14 = vld [vmem:[#allocation4 + $0x1c] sm:$0xf] }
 0x850   :  { %757 = vtanh.f32 %v382_v15 }
 0x856   :  { %v758_v16 = vpop.eup %757 }
 0x857   :  { %385 = vrot.lane.b32.xlu0 %v758_v16, %s885_s15 }
 0x8c9   :  { %v386_v20 = vpop.permute.xlu0 %385 }
 0x8ca   :  { %v388_v21 = vmul.f32 %v386_v20, %v371_v9 }
 0x8cc   :  { %390 = vrot.lane.b32.xlu1 %v388_v21, %s886_s16 }
 0x93e   :  { %v391_v25 = vpop.permute.xlu1 %390 }
 0x93f   :  { %394 = vst.msk [vmem:[#allocation12 + $0xc] sm:$0xf] %vm72_vm0, %v391_v25  ;;  %706 = vmatmul.msk.f32.vlgmr.msrb.gmra.mxu2 %vm186_vm1, %v391_v25 }
 0x9c2   :  { %v414_v27 = vpop.f32.mrf.mxu2 }
 0x9c3   :  { %v419_v28 = vadd.f32 %v418_v26, %v414_v27 }
 0x9c5   :  { %759 = vtanh.f32 %v419_v28  ;;  %v640_v28 = vld [vmem:[#allocation12] sm:$0xf] }
 0x9cb   :  { %v760_v29 = vpop.eup %759 }
 0x9cc   :  { %425 = vrot.lane.b32.xlu2 %v760_v29, %s885_s15  ;;  %v421_v30 = vmul.f32 0.5, %v760_v29  ;;  %v888_v29 = vmov 0.0  }
 0x9ce   :  { %v422_v31 = vadd.f32 0.5, %v421_v30 }
 0x9d0   :  { %v423_v34 = vmul.f32 %v422_v31, %v382_v15 }
 0xa26   :  { %v426_v32 = vpop.permute.xlu2 %425 }
 0xa27   :  { %v428_v33 = vmul.f32 %v426_v32, %v422_v31 }
 0xa29   :  { %430 = vrot.lane.b32.xlu0 %v428_v33, %s886_s16 }
 0xa9b   :  { %v431_v35 = vpop.permute.xlu0 %430 }
 0xa9c   :  { %v433_v36 = vadd.f32 %v431_v35, %v423_v34 }
 0xa9e   :  { %761 = vtanh.f32 %v433_v36 }
 0xaa4   :  { %v762_v37 = vpop.eup %761 }
 0xaa5   :  { %436 = vrot.lane.b32.xlu1 %v762_v37, %s885_s15  ;;  %v643_v37 = vld [vmem:[#allocation12 + $0xc] sm:$0xf] }
 0xb17   :  { %v437_v38 = vpop.permute.xlu1 %436 }
 0xb18   :  { %v439_v39 = vmul.f32 %v437_v38, %v422_v31  ;;  %v641_v31 = vld [vmem:[#allocation12 + $0x4] sm:$0xf] }
 0xb1a   :  { %441 = vrot.lane.b32.xlu2 %v439_v39, %s886_s16 }
 0xb74   :  { %v442_v40 = vpop.permute.xlu2 %441 }
 0xb75   :  { %445 = vst.msk [vmem:[#allocation12 + $0x10] sm:$0xf] %vm72_vm0, %v442_v40  ;;  %707 = vmatmul.msk.f32.vlgmr.msrb.gmra.mxu3 %vm186_vm1, %v442_v40 }
 0xbf8   :  { %v465_v41 = vpop.f32.mrf.mxu3 }
 0xbf9   :  { %v470_v43 = vadd.f32 %v469_v42, %v465_v41  ;;  %v644_v41 = vld [vmem:[#allocation12 + $0x10] sm:$0xf] }
 0xbfb   :  { %763 = vtanh.f32 %v470_v43 }
 0xc01   :  { %v764_v44 = vpop.eup %763 }
 0xc02   :  { %476 = vrot.lane.b32.xlu0 %v764_v44, %s885_s15  ;;  %v472_v45 = vmul.f32 0.5, %v764_v44 }
 0xc04   :  { %v473_v46 = vadd.f32 0.5, %v472_v45 }
 0xc06   :  { %v474_v49 = vmul.f32 %v473_v46, %v433_v36  ;;  %v642_v36 = vld [vmem:[#allocation12 + $0x8] sm:$0xf] }
 0xc74   :  { %v477_v47 = vpop.permute.xlu0 %476 }
 0xc75   :  { %v479_v48 = vmul.f32 %v477_v47, %v473_v46 }
 0xc77   :  { %481 = vrot.lane.b32.xlu1 %v479_v48, %s886_s16 }
 0xce9   :  { %v482_v50 = vpop.permute.xlu1 %481 }
 0xcea   :  { %v484_v51 = vadd.f32 %v482_v50, %v474_v49 }
 0xcec   :  { %765 = vtanh.f32 %v484_v51 }
 0xcf2   :  { %v766_v52 = vpop.eup %765 }
 0xcf3   :  { %487 = vrot.lane.b32.xlu2 %v766_v52, %s885_s15 }
 0xd4d   :  { %v488_v56 = vpop.permute.xlu2 %487 }
 0xd4e   :  { %v490_v57 = vmul.f32 %v488_v56, %v473_v46 }
 0xd50   :  { %492 = vrot.lane.b32.xlu0 %v490_v57, %s886_s16 }
 0xdc2   :  { %v493_v61 = vpop.permute.xlu0 %492 }
 0xdc3   :  { %496 = vst.msk [vmem:[#allocation12 + $0x14] sm:$0xf] %vm72_vm0, %v493_v61  ;;  %708 = vmatmul.msk.f32.vlgmr.msra.gmra.mxu1 %vm186_vm1, %v493_v61 }
 0xdca   :  { %v645_v45 = vld [vmem:[#allocation12 + $0x14] sm:$0xf] }
 0xe40   :  { %v516_v63 = vpop.f32.mrf.mxu1 }
 0xe41   :  { %v521_v0 = vadd.f32 %v520_v62, %v516_v63 }
 0xe43   :  { %767 = vtanh.f32 %v521_v0 }
 0xe49   :  { %v768_v1 = vpop.eup %767 }
 0xe4a   :  { %527 = vrot.lane.b32.xlu1 %v768_v1, %s885_s15  ;;  %v523_v2 = vmul.f32 0.5, %v768_v1 }
 0xe4c   :  { %v524_v3 = vadd.f32 0.5, %v523_v2 }
 0xe4e   :  { %v525_v11 = vmul.f32 %v524_v3, %v484_v51 }
 0xebc   :  { %v528_v4 = vpop.permute.xlu1 %527 }
 0xebd   :  { %v530_v5 = vmul.f32 %v528_v4, %v524_v3 }
 0xebf   :  { %532 = vrot.lane.b32.xlu2 %v530_v5, %s886_s16 }
 0xf19   :  { %v533_v6 = vpop.permute.xlu2 %532 }
 0xf1a   :  { %v535_v7 = vadd.f32 %v533_v6, %v525_v11 }
 0xf1c   :  { %769 = vtanh.f32 %v535_v7 }
 0xf22   :  { %v770_v8 = vpop.eup %769 }
 0xf23   :  { %538 = vrot.lane.b32.xlu0 %v770_v8, %s885_s15 }
 0xf95   :  { %v539_v9 = vpop.permute.xlu0 %538 }
 0xf96   :  { %v541_v10 = vmul.f32 %v539_v9, %v524_v3 }
 0xf98   :  { %543 = vrot.lane.b32.xlu1 %v541_v10, %s886_s16 }
0x100a   :  { %v544_v12 = vpop.permute.xlu1 %543 }
0x100b   :  { %547 = vst.msk [vmem:[#allocation12 + $0x18] sm:$0xf] %vm72_vm0, %v544_v12  ;;  %709 = vmatmul.msk.f32.vlgmr.msra.gmra.mxu2 %vm186_vm1, %v544_v12 }
0x1012   :  { %v646_v47 = vld [vmem:[#allocation12 + $0x18] sm:$0xf] }
0x108e   :  { %v567_v13 = vpop.f32.mrf.mxu2 }
0x108f   :  { %v572_v15 = vadd.f32 %v571_v14, %v567_v13 }
0x1091   :  { %771 = vtanh.f32 %v572_v15 }
0x1097   :  { %v772_v16 = vpop.eup %771 }
0x1098   :  { %578 = vrot.lane.b32.xlu2 %v772_v16, %s885_s15  ;;  %v574_v18 = vmul.f32 0.5, %v772_v16 }
0x109a   :  { %v575_v19 = vadd.f32 0.5, %v574_v18 }
0x109c   :  { %v576_v23 = vmul.f32 %v575_v19, %v535_v7 }
0x10f2   :  { %v579_v20 = vpop.permute.xlu2 %578 }
0x10f3   :  { %v581_v21 = vmul.f32 %v579_v20, %v575_v19 }
0x10f5   :  { %583 = vrot.lane.b32.xlu0 %v581_v21, %s886_s16 }
0x10fd   :  { %614 = vperm.xlu0 %741, %v80_v22  }
0x1167   :  { %v584_v24 = vpop.permute.xlu0 %583 }
0x1168   :  { %v586_v25 = vadd.f32 %v584_v24, %v576_v23 }
0x116a   :  { %773 = vtanh.f32 %v586_v25 }
0x116f   :  { %v615_v26 = vpop.permute.xlu0 %614 }
0x1170   :  { %v774_v27 = vpop.eup %773  ;;  %vm710_vm3 = vcmp.gt.s32.totalorder %v615_v26, 0  ;;  %vm711_vm4 = vcmp.gt.s32.totalorder %v615_v26, 1  ;;  %vm712_vm5 = vcmp.gt.s32.totalorder %v615_v26, 2  ;;  %vm713_vm6 = vcmp.gt.s32.totalorder %v615_v26, 3 }
0x1171   :  { %vm714_vm7 = vcmp.gt.s32.totalorder %v615_v26, 4  ;;  %vm715_vm8 = vcmp.gt.s32.totalorder %v615_v26, 5  ;;  %vm716_vm9 = vcmp.gt.s32.totalorder %v615_v26, 6  ;;  %v718_v30 = vsel %vm710_vm3, 1.0, %v888_v29  ;;  %589 = vrot.lane.b32.xlu1 %v774_v27, %s885_s15 }
0x1172   :  { %v719_v32 = vsel %vm711_vm4, 1.0, %v888_v29  ;;  %v720_v33 = vsel %vm712_vm5, 1.0, %v888_v29  ;;  %v721_v34 = vsel %vm713_vm6, 1.0, %v888_v29  ;;  %v722_v35 = vsel %vm714_vm7, 1.0, %v888_v29 }
0x1173   :  { %v723_v38 = vsel %vm715_vm8, 1.0, %v888_v29  ;;  %v648_v39 = vmul.f32 %v718_v30, %v640_v28  ;;  %v649_v40 = vmul.f32 %v719_v32, %v641_v31  ;;  %v724_v42 = vsel %vm716_vm9, 1.0, %v888_v29 }
0x1174   :  { %v650_v43 = vmul.f32 %v720_v33, %v642_v36  ;;  %v651_v44 = vmul.f32 %v721_v34, %v643_v37  ;;  %v652_v46 = vmul.f32 %v722_v35, %v644_v41  ;;  %v653_v48 = vmul.f32 %v723_v38, %v645_v45 }
0x1175   :  { %656 = vst.msk [vmem:[#allocation12] sm:$0xf] %vm72_vm0, %v648_v39  ;;  %v654_v49 = vmul.f32 %v724_v42, %v646_v47  ;;  %vm717_vm10 = vcmp.gt.s32.totalorder %v615_v26, 7 }
0x1176   :  { %657 = vst.msk [vmem:[#allocation12 + $0x4] sm:$0xf] %vm72_vm0, %v649_v40  ;;  %v725_v54 = vsel %vm717_vm10, 1.0, %v888_v29 }
0x1177   :  { %658 = vst.msk [vmem:[#allocation12 + $0x8] sm:$0xf] %vm72_vm0, %v650_v43 }
0x1178   :  { %659 = vst.msk [vmem:[#allocation12 + $0xc] sm:$0xf] %vm72_vm0, %v651_v44 }
0x1179   :  { %660 = vst.msk [vmem:[#allocation12 + $0x10] sm:$0xf] %vm72_vm0, %v652_v46  ;;  %601 = vrot.lane.b32.xlu1 %v586_v25, %s889_s1 }
0x117a   :  { %661 = vst.msk [vmem:[#allocation12 + $0x14] sm:$0xf] %vm72_vm0, %v653_v48 }
0x117b   :  { %662 = vst.msk [vmem:[#allocation12 + $0x18] sm:$0xf] %vm72_vm0, %v654_v49 }
0x11e3   :  { %v590_v50 = vpop.permute.xlu1 %589 }
0x11e4   :  { %v592_v51 = vmul.f32 %v590_v50, %v575_v19 }
0x11e6   :  { %594 = vrot.lane.b32.xlu2 %v592_v51, %s886_s16 }
0x11eb   :  { %v602_v52 = vpop.permute.xlu1 %601 }
0x11ec   :  { %604 = vst.msk [vmem:[#allocation6] sm:$0xf] %vm72_vm0, %v602_v52 }
0x1240   :  { %v595_v53 = vpop.permute.xlu2 %594 }
0x1241   :  { %598 = vst.msk [vmem:[#allocation12 + $0x1c] sm:$0xf] %vm72_vm0, %v595_v53 }
0x1242   :  { %599 = vst.msk [vmem:[#allocation5] sm:$0xf] %vm72_vm0, %v595_v53 }
0x1248   :  { %v647_v55 = vld [vmem:[#allocation12 + $0x1c] sm:$0xf] }
0x1249   :  { %v655_v56 = vmul.f32 %v725_v54, %v647_v55 }
0x124b   :  { %663 = vst.msk [vmem:[#allocation12 + $0x1c] sm:$0xf] %vm72_vm0, %v655_v56 }
0x124c PF:  { %p727_p1 = scmp.gt.s32.totalorder %s1076_s0, 0 }
0x124e   :  { %667 = sbr.rel (%p727_p1) target bundleno = 4700 (0x125c), region = 39 }
0x1253   :  { %v890_v57 = vmov 0.0  }
0x1254   :  { %669 = vst.msk [vmem:[#allocation12] sm:$0xf] %vm72_vm0, %v890_v57 }
0x1255   :  { %670 = vst.msk [vmem:[#allocation12 + $0x4] sm:$0xf] %vm72_vm0, %v890_v57 }
0x1256   :  { %671 = vst.msk [vmem:[#allocation12 + $0x8] sm:$0xf] %vm72_vm0, %v890_v57 }
0x1257   :  { %672 = vst.msk [vmem:[#allocation12 + $0xc] sm:$0xf] %vm72_vm0, %v890_v57 }
0x1258   :  { %673 = vst.msk [vmem:[#allocation12 + $0x10] sm:$0xf] %vm72_vm0, %v890_v57 }
0x1259   :  { %674 = vst.msk [vmem:[#allocation12 + $0x14] sm:$0xf] %vm72_vm0, %v890_v57 }
0x125a   :  { %675 = vst.msk [vmem:[#allocation12 + $0x18] sm:$0xf] %vm72_vm0, %v890_v57 }
0x125b   :  { %676 = vst.msk [vmem:[#allocation12 + $0x1c] sm:$0xf] %vm72_vm0, %v890_v57 }
0x125c PF:  { %s683_s21 = sshll.u32 %s1082_s6, 4  ;;  %s891_s22 = smov [#allocation12]   ;;  %s684_s21 = int_to_ptr.hbm [resolvable:$true] %s683_s21 }
0x125d   :  { %s681_s23 = sshll.u32 %s891_s22, 4  ;;  %s682_s23 = int_to_ptr.vmem [resolvable:$true] %s681_s23 }
0x125e   :  { %689 = dma.vmem_to_hbm [thread:$0]  %s682_s23, 512, %s684_s21, [#allocation11], %s880_s26, %s880_s26, %s881_s27  }
0x125f   :  { %877 = dma.done.wait [#allocation11], 512  }
0x1260   :  { %878 = vsyncadd [#allocation11], 4294966784 }
0x1261   :  { %694 = vsyncpa [#allocation10], 1 }
0x1262   :  { %695 = vsyncpa [#allocation11], 1 }

</bundles_post_ra>
